<compile_context>
chip_gen: v7x
topology: tpu7x:2x2x1
jax: 0.10.0
libtpu: 0.0.40
codegen_flags: <defaults>
</compile_context>

<pallas_src>
import jax
import jax.numpy as jnp
from jax.experimental import pallas as pl
from jax.experimental.pallas import tpu as pltpu


def _round_up(x, m):
    return ((x + m - 1) // m) * m


def _largest_divisor_tile(extent, granule, cap):
    """Largest multiple of `granule` that divides `extent` and is <= cap."""
    best = granule
    t = granule
    cap = min(cap, extent)
    while t <= cap:
        if extent % t == 0:
            best = t
        t += granule
    return best


def _make_gcn_kernel(tk, xw_block_rows):
    """Kernel for one (row-tile i, K-tile k) step of  out = A @ XW + b.

    If the XW block held in VMEM is larger than the K tile (resident-XW mode),
    the kernel slices the k-th (tk, fp) window out of it; otherwise the block
    already IS the k-th window.
    """
    slice_xw = xw_block_rows > tk

    def kernel(a_ref, xw_ref, b_ref, o_ref):
        k = pl.program_id(1)

        # Output block index depends on i only -> resident across the k axis.
        # Initialize it to the bias once, then accumulate the K reduction.
        @pl.when(k == 0)
        def _():
            o_ref[...] = jnp.broadcast_to(b_ref[...], o_ref.shape)

        if slice_xw:
            start = pl.multiple_of(k * tk, tk)
            xw = xw_ref[pl.ds(start, tk), :]
        else:
            xw = xw_ref[...]

        # int8 A (0/1 exact) widened to bf16 on the VPU; bf16 x bf16 MXU dot
        # with f32 accumulation.
        a = a_ref[...].astype(jnp.bfloat16)
        o_ref[...] += jnp.dot(a, xw, preferred_element_type=jnp.float32)

    return kernel


def gcn_layer(adj, x, w, b, *, tm_max=1024, tk_max=1024,
              xw_resident_budget=6 * 1024 * 1024,
              vmem_budget=28 * 1024 * 1024):
    """GCNLayer forward.

    adj: [N, N] (adj[dst, src] = 1 iff edge src->dst), any real/int dtype
    x:   [N, in_feats]
    w:   [out_feats, in_feats]   (PyTorch nn.Linear weight)
    b:   [out_feats]
    returns [N, out_feats] float32.
    """
    n = adj.shape[0]
    out_feats = w.shape[0]

    # Hoist the cheap O(N*Fin*Fout) linear out of the O(N^2) path, then cast
    # to the MXU-native bf16 (accumulation in the kernel stays f32).
    xw = jnp.dot(x.astype(jnp.float32), w.astype(jnp.float32).T)
    xw = xw.astype(jnp.bfloat16)                       # [N, out_feats]

    # Hardware-granularity padding only (no rounding to the tile size):
    #   dst rows  -> multiple of 32  (int8 A sublane packing)
    #   src cols  -> multiple of 128 (A lane dim / bf16 XW sublane dim)
    #   features  -> multiple of 128 (lane-dense, unmasked output stores)
    fp = _round_up(out_feats, 128)
    n_dst = _round_up(n, 32)
    n_src = _round_up(n, 128)

    # Row tile: as large as possible (divisor of n_dst, multiple of 32).
    tm = _largest_divisor_tile(n_dst, 32, tm_max)
    # v7x has 2 TensorCores: prefer >= 2 row tiles so the parallel axis splits.
    if n_dst // tm < 2:
        tm2 = _largest_divisor_tile(n_dst, 32, max(32, n_dst // 2))
        if n_dst // tm2 >= 2:
            tm = tm2

    # K tile over source nodes.  Keep the whole bf16 XW resident in VMEM when
    # it fits (it is then DMA'd once: constant block index); otherwise stream
    # (tk, fp) XW blocks alongside the A tiles.
    resident_xw = (n_src * fp * 2) <= xw_resident_budget
    tk = _largest_divisor_tile(n_src, 128, tk_max)

    # Keep the double-buffered footprint under a budget that is safe even on
    # v7x (64 MiB physical VMEM).
    def footprint(tm_, tk_):
        a_bytes = 2 * tm_ * tk_                                    # int8 A
        xw_bytes = 2 * (n_src * fp * 2 if resident_xw else tk_ * fp * 2)
        o_bytes = 2 * tm_ * fp * 4                                 # f32 out
        return a_bytes + xw_bytes + o_bytes + fp * 4

    while footprint(tm, tk) > vmem_budget and tm > 32:
        tm = _largest_divisor_tile(n_dst, 32, tm // 2)
    while footprint(tm, tk) > vmem_budget and tk > 128:
        tk = _largest_divisor_tile(n_src, 128, tk // 2)

    # Padded, narrow-dtype operands (zero padding is exact).
    adj_p = jnp.pad(adj.astype(jnp.int8), ((0, n_dst - n), (0, n_src - n)))
    xw_p = jnp.pad(xw, ((0, n_src - n), (0, fp - out_feats)))
    b_p = jnp.pad(b.astype(jnp.float32), (0, fp - out_feats)).reshape(1, fp)

    grid = (n_dst // tm, n_src // tk)

    if resident_xw:
        # Full XW block, constant block index -> loaded once, stays in VMEM.
        xw_spec = pl.BlockSpec((n_src, fp), lambda i, k: (0, 0))
        xw_block_rows = n_src
    else:
        xw_spec = pl.BlockSpec((tk, fp), lambda i, k: (k, 0))
        xw_block_rows = tk

    out = pl.pallas_call(
        _make_gcn_kernel(tk, xw_block_rows),
        out_shape=jax.ShapeDtypeStruct((n_dst, fp), jnp.float32),
        grid_spec=pltpu.PrefetchScalarGridSpec(
            num_scalar_prefetch=0,
            grid=grid,
            in_specs=[
                pl.BlockSpec((tm, tk), lambda i, k: (i, k)),   # int8 A tile
                xw_spec,                                        # bf16 XW
                pl.BlockSpec((1, fp), lambda i, k: (0, 0)),     # f32 bias
            ],
            out_specs=pl.BlockSpec((tm, fp), lambda i, k: (i, 0)),
        ),
        compiler_params=pltpu.CompilerParams(
            dimension_semantics=("parallel", "arbitrary"),
            vmem_limit_bytes=48 * 1024 * 1024),
    )(adj_p, xw_p, b_p)

    return out[:n, :out_feats]


if __name__ == "__main__":
    key = jax.random.PRNGKey(0)
    k_adj, k_x, k_w, k_b = jax.random.split(key, 4)

    N = 16          # number of graph nodes
    IN_FEATS = 32
    OUT_FEATS = 32

    # Deterministic random graph (dense adjacency, A[dst, src] = 1 if edge).
    adj = (jax.random.uniform(k_adj, (N, N)) < 0.3).astype(jnp.float32)
    # Node features.
    x = jax.random.normal(k_x, (N, IN_FEATS), dtype=jnp.float32)
    # Linear params (PyTorch nn.Linear shapes), deterministic init.
    bound = 1.0 / (IN_FEATS ** 0.5)
    w = jax.random.uniform(k_w, (OUT_FEATS, IN_FEATS), minval=-bound, maxval=bound)
    b = jax.random.uniform(k_b, (OUT_FEATS,), minval=-bound, maxval=bound)

    out = jax.block_until_ready(jax.jit(gcn_layer)(adj, x, w, b))
    assert out.shape == (N, OUT_FEATS)

    # Tight check against a reference that uses the same bf16 XW (the kernel's
    # only rounding source; A is 0/1-exact, accumulation is f32).
    xw_bf16 = (x @ w.T).astype(jnp.bfloat16).astype(jnp.float32)
    ref_bf16 = adj @ xw_bf16 + b
    assert jnp.allclose(out, ref_bf16, atol=1e-4, rtol=1e-4), float(
        jnp.max(jnp.abs(out - ref_bf16)))

    # Looser check against the exact f32 reference (bf16 XW costs a few ulps
    # per summand; accumulation stays f32).
    ref = (adj @ x) @ w.T + b
    assert jnp.allclose(out, ref, atol=1e-1, rtol=5e-2), float(
        jnp.max(jnp.abs(out - ref)))

    print("KERNEL_OK")
</pallas_src>

<mosaic_0001>
module attributes {stable_mosaic.version = 11 : i64} {
  func.func @kernel(%arg0: i32, %arg1: i32, %arg2: memref<32x128xi8, #tpu.memory_space<vmem>>, %arg3: memref<128x128xbf16, #tpu.memory_space<vmem>>, %arg4: memref<1x128xf32, #tpu.memory_space<vmem>>, %arg5: memref<32x128xf32, #tpu.memory_space<vmem>>) attributes {dimension_semantics = [#tpu.dimension_semantics<parallel>, #tpu.dimension_semantics<arbitrary>], iteration_bounds = array<i64: 1, 1>, scalar_prefetch = 0 : i64, scratch_operands = 0 : i64, tpu.core_type = #tpu.core_type<tc>, window_params = [{transform_indices = @transform_0, window_bounds = array<i64: 32, 128>}, {pipeline_mode = #tpu.pipeline_mode<synchronous>, transform_indices = @transform_1, window_bounds = array<i64: 128, 128>}, {pipeline_mode = #tpu.pipeline_mode<synchronous>, transform_indices = @transform_2, window_bounds = array<i64: 1, 128>}, {transform_indices = @transform_3, window_bounds = array<i64: 32, 128>}]} {
    %c0_i32 = arith.constant 0 : i32
    %0 = arith.cmpi eq, %arg1, %c0_i32 : i32
    %1 = arith.extui %0 : i1 to i32
    %c0_i32_0 = arith.constant 0 : i32
    %2 = arith.cmpi ne, %1, %c0_i32_0 : i32
    scf.if %2 {
      %c0_8 = arith.constant 0 : index
      %c0_9 = arith.constant 0 : index
      %10 = vector.load %arg4[%c0_8, %c0_9] : memref<1x128xf32, #tpu.memory_space<vmem>>, vector<1x128xf32>
      %11 = vector.shape_cast %10 : vector<1x128xf32> to vector<1x128xf32>
      %12 = vector.broadcast %11 : vector<1x128xf32> to vector<32x128xf32>
      %c0_10 = arith.constant 0 : index
      %c0_11 = arith.constant 0 : index
      %13 = vector.load %arg5[%c0_10, %c0_11] : memref<32x128xf32, #tpu.memory_space<vmem>>, vector<32x128xf32>
      tpu.vector_store %arg5[%c0_10, %c0_11], %12 {strides = array<i32>} : memref<32x128xf32, #tpu.memory_space<vmem>>, vector<32x128xf32>,
    } else {
    }
    %c0 = arith.constant 0 : index
    %c0_1 = arith.constant 0 : index
    %3 = vector.load %arg3[%c0, %c0_1] : memref<128x128xbf16, #tpu.memory_space<vmem>>, vector<128x128xbf16>
    %c0_2 = arith.constant 0 : index
    %c0_3 = arith.constant 0 : index
    %4 = vector.load %arg2[%c0_2, %c0_3] : memref<32x128xi8, #tpu.memory_space<vmem>>, vector<32x128xi8>
    %5 = arith.sitofp %4 : vector<32x128xi8> to vector<32x128xbf16>
    %c0_4 = arith.constant 0 : index
    %c0_5 = arith.constant 0 : index
    %6 = vector.load %arg5[%c0_4, %c0_5] : memref<32x128xf32, #tpu.memory_space<vmem>>, vector<32x128xf32>
    %cst = arith.constant dense<0.000000e+00> : vector<32x128xf32>
    %7 = tpu.matmul %5, %3, %cst {dimension_numbers = #tpu.dot_dimension_numbers<[1], [0], [0], [1], [0, 0, 1, 1], [], []>} : vector<32x128xbf16>, vector<128x128xbf16>, vector<32x128xf32> -> vector<32x128xf32>
    %8 = arith.addf %6, %7 : vector<32x128xf32>
    %c0_6 = arith.constant 0 : index
    %c0_7 = arith.constant 0 : index
    %9 = vector.load %arg5[%c0_6, %c0_7] : memref<32x128xf32, #tpu.memory_space<vmem>>, vector<32x128xf32>
    tpu.vector_store %arg5[%c0_6, %c0_7], %8 {strides = array<i32>} : memref<32x128xf32, #tpu.memory_space<vmem>>, vector<32x128xf32>,
    return
  }
  func.func @transform_0(%arg0: i32, %arg1: i32) -> (i32, i32) {
    %c0_i32 = arith.constant 0 : i32
    return %arg0, %arg1 : i32, i32
  }
  func.func @transform_1(%arg0: i32, %arg1: i32) -> (i32, i32) {
    %c0_i32 = arith.constant 0 : i32
    %c0_i32_0 = arith.constant 0 : i32
    %c0_i32_1 = arith.constant 0 : i32
    return %c0_i32, %c0_i32_0 : i32, i32
  }
  func.func @transform_2(%arg0: i32, %arg1: i32) -> (i32, i32) {
    %c0_i32 = arith.constant 0 : i32
    %c0_i32_0 = arith.constant 0 : i32
    %c0_i32_1 = arith.constant 0 : i32
    return %c0_i32, %c0_i32_0 : i32, i32
  }
  func.func @transform_3(%arg0: i32, %arg1: i32) -> (i32, i32) {
    %c0_i32 = arith.constant 0 : i32
    %c0_i32_0 = arith.constant 0 : i32
    return %arg0, %c0_i32 : i32, i32
  }
}

</mosaic_0001>

<bundles_post_ra>
// kernel: gcn_layer.1
= control target key start
LH: loop header
LB: loop body
LE: loop exit
PB: predicated region body
PF: predicated region fallthrough
CT: control target
= control target key end

     0   :  { %s271_s1 = inlined_call_operand.vmem [shape: bf16[128,128], index: 1, kind: input, shape index: {}]   ;;  %s272_s0 = inlined_call_operand.vmem [shape: s8[32,128], index: 0, kind: input, shape index: {}]   ;;  %s273_s2 = inlined_call_operand.vmem [shape: f32[1,128], index: 2, kind: input, shape index: {}]   ;;  %s274_s3 = inlined_call_operand.vmem [shape: f32[32,128], index: 3, kind: output, shape index: {}]  }
   0x1   :  { %v201_v0 = vld [vmem:[%s271_s1] sm:$0xff]   ;;  %v202_v1 = vld [vmem:[%s271_s1 + $0x8] sm:$0xff]   ;;  %v203_v2 = vld [vmem:[%s271_s1 + $0x10] sm:$0xff]  }
   0x2   :  { %181 = vmatprep.subr.bf16.mxu0 %v201_v0  ;;  %v204_v3 = vld [vmem:[%s271_s1 + $0x18] sm:$0xff]   ;;  %v46_v4 = vld [vmem:[%s272_s0] sm:$0xff]  ;;  %v206_v7 = vld [vmem:[%s271_s1 + $0x28] sm:$0xff]  }
   0x3   :  { %182 = vmatpush3.bf16.msra.mxu0 %v201_v0  ;;  %v47_v5 = vunpack.c.l.s8.bf16 %v46_v4  ;;  %v205_v6 = vld [vmem:[%s271_s1 + $0x20] sm:$0xff]   ;;  %v207_v8 = vld [vmem:[%s271_s1 + $0x30] sm:$0xff]   ;;  %v208_v9 = vld [vmem:[%s271_s1 + $0x38] sm:$0xff]   ;;  %v48_v10 = vunpack.c.h.s8.bf16 %v46_v4 }
   0x4   :  { %183 = vmatprep.subr.bf16.mxu0 %v202_v1  ;;  %v162_v11 = vld [vmem:[%s273_s2] ss:$0 sm:$0xff] }
   0x5   :  { %197 = vmatprep.mubr.bf16.mxu0 %v47_v5 }
   0x7   :  { %184 = vmatpush3.bf16.msra.mxu0 %v202_v1 }
   0x8   :  { %185 = vmatprep.subr.bf16.mxu0 %v203_v2 }
   0xb   :  { %186 = vmatpush3.bf16.msra.mxu0 %v203_v2 }
   0xc   :  { %187 = vmatprep.subr.bf16.mxu0 %v204_v3 }
   0xf   :  { %188 = vmatpush3.bf16.msra.mxu0 %v204_v3 }
  0x10   :  { %189 = vmatprep.subr.bf16.mxu0 %v205_v6 }
  0x13   :  { %190 = vmatpush3.bf16.msra.mxu0 %v205_v6 }
  0x14   :  { %191 = vmatprep.subr.bf16.mxu0 %v206_v7 }
  0x17   :  { %192 = vmatpush3.bf16.msra.mxu0 %v206_v7 }
  0x18   :  { %193 = vmatprep.subr.bf16.mxu0 %v207_v8 }
  0x1b   :  { %194 = vmatpush3.bf16.msra.mxu0 %v207_v8 }
  0x1c   :  { %195 = vmatprep.subr.bf16.mxu0 %v208_v9 }
  0x1f   :  { %196 = vmatpush3.bf16.msra.mxu0 %v208_v9 }
  0x22   :  { %198 = vmatmul.mubr.bf16.vlgmr.msra.gmra.mrb[0].mxu0 %v48_v10 }
  0xf5   :  { %v199_v12 = vpop.f32.mrb[0].mxu0 }
  0xf6   :  { %v152_v13 = vadd.f32 %v199_v12, %v162_v11  ;;  %v135_v14 = vpop.f32.mrb[1].mxu0 }
  0xf7   :  { %v150_v15 = vadd.f32 %v162_v11, %v135_v14  ;;  %v200_v16 = vpop.f32.mrb[2].mxu0 }
  0xf8   :  { %156 = vst [vmem:[%s274_s3 + $0x10] sm:$0xff] %v152_v13  ;;  %v153_v17 = vadd.f32 %v200_v16, %v162_v11  ;;  %v138_v18 = vpop.f32.mrb[3].mxu0 }
  0xf9   :  { %154 = vst [vmem:[%s274_s3] sm:$0xff] %v150_v15  ;;  %v151_v19 = vadd.f32 %v162_v11, %v138_v18 }
  0xfa   :  { %157 = vst [vmem:[%s274_s3 + $0x18] sm:$0xff] %v153_v17 }
  0xfb   :  { %155 = vst [vmem:[%s274_s3 + $0x8] sm:$0xff] %v151_v19 }

</bundles_post_ra>
